<compile_context>
chip_gen: v7x
topology: tpu7x:2x2x1
jax: 0.10.0
libtpu: 0.0.40
codegen_flags: <defaults>
</compile_context>

<pallas_src>
import jax
import jax.numpy as jnp
from jax.experimental import pallas as pl
from jax.experimental.pallas import tpu as pltpu

# "config" from the reference module (synthetic, small):
DOC_EMB_SIZE = 16      # -> D1 = doc_emb_size * 2 = 32
TITLE_EMB_SIZE = 16    # -> D2 = title_emb_size * 2 = 32
D1 = DOC_EMB_SIZE * 2
D2 = TITLE_EMB_SIZE * 2
LANE = 128             # TPU lane width


def attention_kernel(x_ref, wc_ref, o_ref):
    """One batch block per grid step, batch-in-lanes layout.

    x_ref:  (S, D1, B_BLK)  input sequences, batch rows in the lane axis (VMEM)
    wc_ref: (D1, B_BLK)     precomputed W @ context per batch row (VMEM)
    o_ref:  (D1, B_BLK)     pooled output (already in store orientation)
    """
    x = x_ref[...]                                     # (S, D1, B) f32
    wc = wc_ref[...]                                   # (D1, B)    f32

    # Bilinear score: s[t, b] = sum_d x[t, d, b] * wc[d, b].
    # (The bilinear bias is a uniform shift of every score of a row and cancels
    #  in the softmax, so it is intentionally not added.)
    scores = jnp.sum(x * wc[None, :, :], axis=1)       # (S, B): sublane reduce over D1

    # Softmax over the sequence axis; every lane is an independent batch row.
    m = jnp.max(scores, axis=0, keepdims=True)         # (1, B)
    p = jnp.exp(scores - m)                            # (S, B)
    denom = jnp.sum(p, axis=0, keepdims=True)          # (1, B)
    p = p * pl.reciprocal(denom, approx=True)          # EUP slot, off the VPU path

    # Weighted sum over the sequence: pure VPU accumulation over the leading
    # axis; result is already in the lane-dense (D1, B) store orientation.
    pooled = jnp.sum(x * p[:, None, :], axis=0)        # (D1, B)
    o_ref[...] = pooled.astype(o_ref.dtype)


def _round_up(n, m):
    return ((n + m - 1) // m) * m


def _pick_b_blk(batch):
    """Default batch block: as large as possible while keeping >= 2 grid steps
    (so dimension_semantics=('parallel',) can shard blocks across TensorCores
    on megacore / v7x parts); shrinks toward the lane-aligned batch for small B."""
    b128 = _round_up(max(batch, 1), LANE)
    for cand in (2048, 1024, 512):
        if b128 >= 2 * cand:
            return cand
    return min(512, b128)


def attention_forward(x, context, w, bias, *, b_blk=None):
    """x: (B, S, D1) f32, context: (B, D2) f32, w: (1, D1, D2), bias: (1,) -> (B, D1).

    b_blk: batch rows per grid step (rounded up to a multiple of 128). With the
    dense batch-in-lanes layout an x block is only ~b_blk KiB, so 512-2048 is
    safe on v5e (16 MiB default scoped VMEM), v6e and v7x (64 MiB physical).
    """
    B, S, d1 = x.shape
    d2 = context.shape[1]
    assert d1 == D1 and d2 == D2

    # Hoist the (B, D2) @ (D2, D1) half of the bilinear out of the kernel:
    # one well-shaped MXU matmul instead of B tiny K=32/N=1 matvecs.
    w2 = w.reshape(d1, d2)
    wc = jnp.dot(context, w2.T, preferred_element_type=jnp.float32)     # (B, D1)
    # `bias` cancels in the softmax (shift invariance) -> not used in compute.
    _ = bias

    if b_blk is None:
        b_blk = _pick_b_blk(B)
    b_blk = max(LANE, _round_up(b_blk, LANE))
    n_blk = pl.cdiv(B, b_blk)
    b_pad = n_blk * b_blk

    # Pad only when B is not block-aligned; the pad rides along with the layout
    # materialization below (padded rows are independent, finite, and sliced off).
    if b_pad != B:
        x = jnp.pad(x, ((0, b_pad - B), (0, 0), (0, 0)))
        wc = jnp.pad(wc, ((0, b_pad - B), (0, 0)))

    # Batch-in-lanes layout. One XLA layout pass over x; a producer that can
    # emit x already as (S, D1, B) makes this free.
    xt = jnp.transpose(x, (1, 2, 0))                                    # (S, D1, b_pad)
    wct = wc.T                                                          # (D1, b_pad)

    out_t = pl.pallas_call(
        attention_kernel,
        out_shape=jax.ShapeDtypeStruct((d1, b_pad), x.dtype),
        grid_spec=pltpu.PrefetchScalarGridSpec(
            num_scalar_prefetch=0,
            grid=(n_blk,),
            in_specs=[
                pl.BlockSpec((S, d1, b_blk), lambda b: (0, 0, b)),      # x, batch in lanes
                pl.BlockSpec((d1, b_blk), lambda b: (0, b)),            # context @ W^T
            ],
            out_specs=pl.BlockSpec((d1, b_blk), lambda b: (0, b)),      # (D1, B) output
        ),
        compiler_params=pltpu.CompilerParams(
            dimension_semantics=("parallel",),
        ),
    )(xt, wct)

    return out_t.T[:B]                                                   # (B, D1)


def attention_reference(x, context, w, bias):
    """Pure-JAX reference mirroring the PyTorch forward exactly (incl. bias)."""
    B, S, d1 = x.shape
    w2 = w.reshape(d1, -1)
    wc = context @ w2.T                                     # (B, D1)
    scores = jnp.einsum("bsd,bd->bs", x, wc) + bias[0]      # (B, S)
    attn = jax.nn.softmax(scores, axis=1)[..., None]        # (B, S, 1)
    return jnp.sum(x * attn, axis=1)                        # (B, D1)


if __name__ == "__main__":
    key = jax.random.PRNGKey(0)
    kx, kc, kw, kb = jax.random.split(key, 4)

    # Deterministic bilinear parameters (nn.Bilinear(D1, D2, 1): weight (1, D1, D2), bias (1,))
    bound = 1.0 / (D1 ** 0.5)
    w = jax.random.uniform(kw, (1, D1, D2), dtype=jnp.float32, minval=-bound, maxval=bound)
    bias = jax.random.uniform(kb, (1,), dtype=jnp.float32, minval=-bound, maxval=bound)

    # Primary small case (matches the module's intended usage shapes).
    B, S = 2, 8
    x = jax.random.normal(kx, (B, S, D1), dtype=jnp.float32)
    context = jax.random.normal(kc, (B, D2), dtype=jnp.float32)

    out = attention_forward(x, context, w, bias)
    jax.block_until_ready(out)
    ref = attention_reference(x, context, w, bias)
    assert out.shape == (B, D1)
    assert jnp.allclose(out, ref, rtol=1e-2, atol=2e-3), "Pallas output mismatch vs reference"

    # Multi-block case: explicit small block -> 3 grid steps + batch-remainder path.
    B2 = 260
    kx2, kc2 = jax.random.split(kb, 2)
    x2 = jax.random.normal(kx2, (B2, S, D1), dtype=jnp.float32)
    c2 = jax.random.normal(kc2, (B2, D2), dtype=jnp.float32)
    ref2 = attention_reference(x2, c2, w, bias)

    out2 = attention_forward(x2, c2, w, bias, b_blk=128)     # grid of 3 parallel blocks
    jax.block_until_ready(out2)
    assert out2.shape == (B2, D1)
    assert jnp.allclose(out2, ref2, rtol=1e-2, atol=2e-3), "Pallas output mismatch (multi-block)"

    out3 = attention_forward(x2, c2, w, bias)                # default heuristic block size
    jax.block_until_ready(out3)
    assert jnp.allclose(out3, ref2, rtol=1e-2, atol=2e-3), "Pallas output mismatch (default block)"

    print("KERNEL_OK")
</pallas_src>

<mosaic_0001>
module attributes {stable_mosaic.version = 11 : i64} {
  func.func @attention_kernel(%arg0: i32, %arg1: memref<8x32x128xf32, #tpu.memory_space<vmem>>, %arg2: memref<32x128xf32, #tpu.memory_space<vmem>>, %arg3: memref<32x128xf32, #tpu.memory_space<vmem>>) attributes {dimension_semantics = [#tpu.dimension_semantics<parallel>], iteration_bounds = array<i64: 1>, scalar_prefetch = 0 : i64, scratch_operands = 0 : i64, tpu.core_type = #tpu.core_type<tc>, window_params = [{transform_indices = @transform_0, window_bounds = array<i64: 8, 32, 128>}, {transform_indices = @transform_1, window_bounds = array<i64: 32, 128>}, {transform_indices = @transform_2, window_bounds = array<i64: 32, 128>}]} {
    %c0 = arith.constant 0 : index
    %c0_0 = arith.constant 0 : index
    %c0_1 = arith.constant 0 : index
    %0 = vector.load %arg1[%c0, %c0_0, %c0_1] : memref<8x32x128xf32, #tpu.memory_space<vmem>>, vector<8x32x128xf32>
    %c0_2 = arith.constant 0 : index
    %c0_3 = arith.constant 0 : index
    %1 = vector.load %arg2[%c0_2, %c0_3] : memref<32x128xf32, #tpu.memory_space<vmem>>, vector<32x128xf32>
    %2 = vector.shape_cast %1 : vector<32x128xf32> to vector<1x32x128xf32>
    %3 = vector.broadcast %2 : vector<1x32x128xf32> to vector<8x32x128xf32>
    %4 = arith.mulf %0, %3 : vector<8x32x128xf32>
    %cst = arith.constant dense<0.000000e+00> : vector<8x128xf32>
    %5 = vector.multi_reduction <add>, %4, %cst [1] : vector<8x32x128xf32> to vector<8x128xf32>
    %cst_4 = arith.constant dense<0xFF800000> : vector<128xf32>
    %6 = vector.multi_reduction <maximumf>, %5, %cst_4 [0] : vector<8x128xf32> to vector<128xf32>
    %7 = vector.shape_cast %6 : vector<128xf32> to vector<1x128xf32>
    %8 = vector.broadcast %7 : vector<1x128xf32> to vector<8x128xf32>
    %9 = arith.subf %5, %8 : vector<8x128xf32>
    %10 = math.exp %9 : vector<8x128xf32>
    %cst_5 = arith.constant dense<0.000000e+00> : vector<128xf32>
    %11 = vector.multi_reduction <add>, %10, %cst_5 [0] : vector<8x128xf32> to vector<128xf32>
    %12 = vector.shape_cast %11 : vector<128xf32> to vector<1x128xf32>
    %13 = tpu.reciprocal %12 {approx = true} : vector<1x128xf32> -> vector<1x128xf32>
    %14 = vector.broadcast %13 : vector<1x128xf32> to vector<8x128xf32>
    %15 = arith.mulf %10, %14 : vector<8x128xf32>
    %16 = vector.shape_cast %15 : vector<8x128xf32> to vector<8x1x128xf32>
    %17 = vector.broadcast %16 : vector<8x1x128xf32> to vector<8x32x128xf32>
    %18 = arith.mulf %0, %17 : vector<8x32x128xf32>
    %cst_6 = arith.constant dense<0.000000e+00> : vector<32x128xf32>
    %19 = vector.multi_reduction <add>, %18, %cst_6 [0] : vector<8x32x128xf32> to vector<32x128xf32>
    %c0_7 = arith.constant 0 : index
    %c0_8 = arith.constant 0 : index
    %20 = vector.load %arg3[%c0_7, %c0_8] : memref<32x128xf32, #tpu.memory_space<vmem>>, vector<32x128xf32>
    tpu.vector_store %arg3[%c0_7, %c0_8], %19 {strides = array<i32>} : memref<32x128xf32, #tpu.memory_space<vmem>>, vector<32x128xf32>,
    return
  }
  func.func @transform_0(%arg0: i32) -> (i32, i32, i32) {
    %c0_i32 = arith.constant 0 : i32
    %c0_i32_0 = arith.constant 0 : i32
    %c0_i32_1 = arith.constant 0 : i32
    return %c0_i32, %c0_i32_0, %arg0 : i32, i32, i32
  }
  func.func @transform_1(%arg0: i32) -> (i32, i32) {
    %c0_i32 = arith.constant 0 : i32
    %c0_i32_0 = arith.constant 0 : i32
    return %c0_i32, %arg0 : i32, i32
  }
  func.func @transform_2(%arg0: i32) -> (i32, i32) {
    %c0_i32 = arith.constant 0 : i32
    %c0_i32_0 = arith.constant 0 : i32
    return %c0_i32, %arg0 : i32, i32
  }
}

</mosaic_0001>

<bundles_post_ra>
// kernel: tpu_custom_call.1
= control target key start
LH: loop header
LB: loop body
LE: loop exit
PB: predicated region body
PF: predicated region fallthrough
CT: control target
= control target key end

     0   :  { %7 = vsyncpa [#allocation3], 0  ;;  %s662_s0 = inlined_call_operand.hbm [shape: f32[8,32,128], index: 0, kind: input, shape index: {}]   ;;  %s663_s1 = inlined_call_operand.hbm [shape: f32[32,128], index: 1, kind: input, shape index: {}]   ;;  %s664_s2 = inlined_call_operand.hbm [shape: f32[32,128], index: 2, kind: output, shape index: {}]  }
   0x1   :  { %8 = vsyncpa [#allocation6], 0 }
   0x2   :  { %9 = vsyncpa [#allocation4], 0  ;;  %s469_s9 = smov [#allocation2]   ;;  %s397_s13 = scalar_lea.hbm %s662_s0, 4096 }
   0x3   :  { %s15_s10 = sshll.u32 %s469_s9, 4  ;;  %p398_p0 = scmp.ne.s32.totalorder %s662_s0, %s397_s13  ;;  %s16_s10 = int_to_ptr.vmem [resolvable:$true] %s15_s10 }
   0x4   :  { %p401_p1 = scmp.lt.u32.totalorder %s397_s13, %s662_s0 }
   0x6   :  { %p403_p2 = pnand %p401_p1, %p398_p0 }
   0x8   :  { %406 = shalt.err (!%p403_p2)
}
   0x9   :  { %s407_s18 = scalar_lea.vmem %s16_s10, 4096  ;;  %p412_p4 = scmp.lt.s32.totalorder %s16_s10, %s16_s10 }
   0xa   :  { %p408_p3 = scmp.ne.s32.totalorder %s16_s10, %s407_s18  ;;  %p413_p5 = scmp.lt.s32.totalorder %s407_s18, %s407_s18 }
   0xc   :  { %p414_p6 = por %p413_p5, %p412_p4 }
   0xe   :  { %p415_p7 = pnand %p414_p6, %p408_p3 }
  0x10   :  { %418 = shalt.err (!%p415_p7)
}
  0x11   :  { %s470_s19 = smov 128   ;;  %s471_s20 = smov 8  }
  0x12   :  { %21 = dma.hbm_to_vmem [thread:$0]  %s662_s0, 4096, %s16_s10, [#allocation3], %s470_s19, %s470_s19, %s471_s20  }
  0x13   :  { %s472_s23 = smov [#allocation5]   ;;  %s419_s27 = scalar_lea.hbm %s663_s1, 512 }
  0x14   :  { %s27_s24 = sshll.u32 %s472_s23, 4  ;;  %p420_p8 = scmp.ne.s32.totalorder %s663_s1, %s419_s27  ;;  %s28_s24 = int_to_ptr.vmem [resolvable:$true] %s27_s24 }
  0x15   :  { %p423_p9 = scmp.lt.u32.totalorder %s419_s27, %s663_s1 }
  0x17   :  { %p425_p10 = pnand %p423_p9, %p420_p8 }
  0x19   :  { %428 = shalt.err (!%p425_p10)
}
  0x1a   :  { %s429_s4 = scalar_lea.vmem %s28_s24, 512  ;;  %p434_p12 = scmp.lt.s32.totalorder %s28_s24, %s28_s24 }
  0x1b   :  { %p430_p11 = scmp.ne.s32.totalorder %s28_s24, %s429_s4  ;;  %p435_p13 = scmp.lt.s32.totalorder %s429_s4, %s429_s4 }
  0x1d   :  { %p436_p0 = por %p435_p13, %p434_p12 }
  0x1f   :  { %p437_p1 = pnand %p436_p0, %p430_p11 }
  0x21   :  { %440 = shalt.err (!%p437_p1)
}
  0x22   :  { %33 = dma.hbm_to_vmem [thread:$0]  %s663_s1, 512, %s28_s24, [#allocation6], %s470_s19, %s470_s19, %s471_s20  }
  0x23   :  { %463 = dma.done.wait [#allocation3], 4096  }
  0x24   :  { %464 = vsyncadd [#allocation3], 4294963200 }
  0x25   :  { %465 = dma.done.wait [#allocation6], 512  }
  0x26   :  { %466 = vsyncadd [#allocation6], 4294966784  ;;  %v519_v0 = vld [vmem:[#allocation2] sm:$0xff]  ;;  %v521_v1 = vld [vmem:[#allocation2 + $0x8] sm:$0xff]  ;;  %vm220_vm0 = vcmask 1041409   ;;  %vm223_vm1 = vcmask 1042434  }
  0x27   :  { %v523_v2 = vld [vmem:[#allocation2 + $0x10] sm:$0xff]  ;;  %v525_v3 = vld [vmem:[#allocation2 + $0x18] sm:$0xff]  ;;  %v527_v4 = vld [vmem:[#allocation2 + $0x20] sm:$0xff]  ;;  %vm226_vm2 = vcmask 1043459   ;;  %vm229_vm3 = vcmask 1044484   ;;  %vm232_vm4 = vcmask 1045509  }
  0x28   :  { %685 = vst [vmem:[#allocation11_spill] sm:$0xff] %v525_v3  ;;  %v529_v5 = vld [vmem:[#allocation2 + $0x28] sm:$0xff]  ;;  %v531_v6 = vld [vmem:[#allocation2 + $0x40] sm:$0xff]  ;;  %v533_v7 = vld [vmem:[#allocation2 + $0x30] sm:$0xff]  ;;  %vm235_vm5 = vcmask 1046534   ;;  %vm238_vm6 = vcmask 1047559  }
  0x29   :  { %686 = vst [vmem:[#allocation12_spill] sm:$0xff] %v533_v7  ;;  %v535_v8 = vld [vmem:[#allocation2 + $0x38] sm:$0xff]  ;;  %v537_v9 = vld [vmem:[#allocation2 + $0x48] sm:$0xff]  ;;  %v539_v10 = vld [vmem:[#allocation2 + $0x50] sm:$0xff]  ;;  %s473_s1 = smov [#allocation7]  }
  0x2a   :  { %687 = vst [vmem:[#allocation13_spill] sm:$0xff] %v535_v8  ;;  %688 = vst [vmem:[#allocation14_spill] sm:$0xff] %v539_v10  ;;  %v541_v11 = vld [vmem:[#allocation2 + $0x60] sm:$0xff]  ;;  %v543_v12 = vld [vmem:[#allocation2 + $0x58] sm:$0xff]  ;;  %s361_s6 = sshll.u32 %s473_s1, 4  ;;  %s362_s6 = int_to_ptr.vmem [resolvable:$true] %s361_s6 }
  0x2b   :  { %689 = vst [vmem:[#allocation15_spill] sm:$0xff] %v543_v12  ;;  %v545_v13 = vld [vmem:[#allocation2 + $0x68] sm:$0xff]  ;;  %v547_v14 = vld [vmem:[#allocation2 + $0x70] sm:$0xff]  ;;  %v549_v15 = vld [vmem:[#allocation2 + $0x78] sm:$0xff]  ;;  %s441_s7 = scalar_lea.vmem %s362_s6, 512  ;;  %p446_p3 = scmp.lt.s32.totalorder %s362_s6, %s362_s6 }
  0x2c   :  { %690 = vst [vmem:[#allocation16_spill] sm:$0xff] %v547_v14  ;;  %691 = vst [vmem:[#allocation17_spill] sm:$0xff] %v549_v15  ;;  %v551_v16 = vld [vmem:[#allocation2 + $0x80] sm:$0xff]  ;;  %v553_v17 = vld [vmem:[#allocation2 + $0x88] sm:$0xff]  ;;  %p442_p2 = scmp.ne.s32.totalorder %s362_s6, %s441_s7  ;;  %p447_p4 = scmp.lt.s32.totalorder %s441_s7, %s441_s7 }
  0x2d   :  { %692 = vst [vmem:[#allocation18_spill] sm:$0xff] %v553_v17  ;;  %v555_v18 = vld [vmem:[#allocation2 + $0x90] sm:$0xff]  ;;  %v557_v19 = vld [vmem:[#allocation2 + $0x98] sm:$0xff]  ;;  %v72_v20 = vld [vmem:[#allocation5] sm:$0xff] }
  0x2e   :  { %693 = vst [vmem:[#allocation19_spill] sm:$0xff] %v555_v18  ;;  %694 = vst [vmem:[#allocation20_spill] sm:$0xff] %v557_v19  ;;  %v73_v21 = vld [vmem:[#allocation5 + $0x8] sm:$0xff]  ;;  %v74_v22 = vld [vmem:[#allocation5 + $0x10] sm:$0xff]  ;;  %v76_v24 = vmul.f32 %v72_v20, %v519_v0  ;;  %v80_v25 = vmul.f32 %v72_v20, %v527_v4  ;;  %v84_v26 = vmul.f32 %v72_v20, %v531_v6  ;;  %p448_p5 = por %p447_p4, %p446_p3 }
  0x2f   :  { %v75_v23 = vld [vmem:[#allocation5 + $0x18] sm:$0xff]  ;;  %v88_v27 = vmul.f32 %v72_v20, %v541_v11  ;;  %v563_v28 = vld [vmem:[#allocation2 + $0xa0] sm:$0xff]  ;;  %v565_v29 = vld [vmem:[#allocation2 + $0xa8] sm:$0xff]  ;;  %v77_v31 = vmul.f32 %v73_v21, %v521_v1  ;;  %v78_v32 = vmul.f32 %v74_v22, %v523_v2  ;;  %v81_v34 = vmul.f32 %v73_v21, %v529_v5 }
  0x30   :  { %695 = vst [vmem:[#allocation21_spill] sm:$0xff] %v565_v29  ;;  %v567_v30 = vld [vmem:[#allocation2 + $0xb0] sm:$0xff]  ;;  %v79_v33 = vmul.f32 %v75_v23, %v525_v3  ;;  %v573_v35 = vld [vmem:[#allocation2 + $0xb8] sm:$0xff]  ;;  %v575_v36 = vld [vmem:[#allocation2 + $0xc0] sm:$0xff]  ;;  %v82_v38 = vmul.f32 %v74_v22, %v533_v7  ;;  %v83_v39 = vmul.f32 %v75_v23, %v535_v8  ;;  %v85_v40 = vmul.f32 %v73_v21, %v537_v9  ;;  %p449_p6 = pnand %p448_p5, %p442_p2 }
  0x31   :  { %696 = vst [vmem:[#allocation22_spill] sm:$0xff] %v567_v30  ;;  %697 = vst [vmem:[#allocation23_spill] sm:$0xff] %v573_v35  ;;  %v577_v37 = vld [vmem:[#allocation2 + $0xc8] sm:$0xff]  ;;  %v86_v41 = vmul.f32 %v74_v22, %v539_v10  ;;  %v583_v42 = vld [vmem:[#allocation2 + $0xd0] sm:$0xff]  ;;  %v87_v45 = vmul.f32 %v75_v23, %v543_v12  ;;  %v89_v46 = vmul.f32 %v73_v21, %v545_v13 }
  0x32   :  { %698 = vst [vmem:[#allocation24_spill] sm:$0xff] %v575_v36  ;;  %699 = vst [vmem:[#allocation25_spill] sm:$0xff] %v577_v37  ;;  %v585_v43 = vld [vmem:[#allocation2 + $0xd8] sm:$0xff]  ;;  %v587_v44 = vld [vmem:[#allocation2 + $0xe0] sm:$0xff]  ;;  %v90_v47 = vmul.f32 %v74_v22, %v547_v14  ;;  %v91_v48 = vmul.f32 %v75_v23, %v549_v15  ;;  %v92_v52 = vmul.f32 %v72_v20, %v551_v16 }
  0x33   :  { %700 = vst [vmem:[#allocation26_spill] sm:$0xff] %v583_v42  ;;  %701 = vst [vmem:[#allocation27_spill] sm:$0xff] %v585_v43  ;;  %v593_v49 = vld [vmem:[#allocation2 + $0xe8] sm:$0xff]  ;;  %v595_v50 = vld [vmem:[#allocation2 + $0xf0] sm:$0xff]  ;;  %v93_v53 = vmul.f32 %v73_v21, %v553_v17  ;;  %v94_v54 = vmul.f32 %v74_v22, %v555_v18  ;;  %v95_v55 = vmul.f32 %v75_v23, %v557_v19 }
  0x34   :  { %702 = vst [vmem:[#allocation28_spill] sm:$0xff] %v587_v44  ;;  %703 = vst [vmem:[#allocation29_spill] sm:$0xff] %v593_v49  ;;  %v597_v51 = vld [vmem:[#allocation2 + $0xf8] sm:$0xff]  ;;  %v96_v56 = vmul.f32 %v72_v20, %v563_v28  ;;  %v97_v57 = vmul.f32 %v73_v21, %v565_v29  ;;  %v98_v58 = vmul.f32 %v74_v22, %v567_v30 }
  0x35   :  { %704 = vst [vmem:[#allocation30_spill] sm:$0xff] %v595_v50  ;;  %v99_v59 = vmul.f32 %v75_v23, %v573_v35  ;;  %v100_v60 = vmul.f32 %v72_v20, %v575_v36  ;;  %v101_v61 = vmul.f32 %v73_v21, %v577_v37  ;;  %v102_v62 = vmul.f32 %v74_v22, %v583_v42 }
  0x36   :  { %v103_v63 = vmul.f32 %v75_v23, %v585_v43  ;;  %v104_v15 = vmul.f32 %v72_v20, %v587_v44  ;;  %v105_v19 = vmul.f32 %v73_v21, %v593_v49  ;;  %v106_v18 = vmul.f32 %v74_v22, %v595_v50 }
  0x37   :  { %v107_v12 = vmul.f32 %v75_v23, %v597_v51  ;;  %v108_v29 = vadd.f32 %v77_v31, %v76_v24  ;;  %v117_v30 = vadd.f32 %v81_v34, %v80_v25  ;;  %v126_v8 = vadd.f32 %v85_v40, %v84_v26 }
  0x38   :  { %v135_v35 = vadd.f32 %v89_v46, %v88_v27  ;;  %v144_v3 = vadd.f32 %v93_v53, %v92_v52  ;;  %v153_v14 = vadd.f32 %v97_v57, %v96_v56  ;;  %v162_v17 = vadd.f32 %v101_v61, %v100_v60 }
  0x39   :  { %v171_v37 = vadd.f32 %v105_v19, %v104_v15  ;;  %v109_v36 = vadd.f32 %v108_v29, %v78_v32  ;;  %v118_v42 = vadd.f32 %v117_v30, %v82_v38  ;;  %v127_v10 = vadd.f32 %v126_v8, %v86_v41 }
  0x3a   :  { %v136_v43 = vadd.f32 %v135_v35, %v90_v47  ;;  %v145_v7 = vadd.f32 %v144_v3, %v94_v54  ;;  %v154_v20 = vadd.f32 %v153_v14, %v98_v58  ;;  %v163_v44 = vadd.f32 %v162_v17, %v102_v62 }
  0x3b   :  { %v172_v21 = vadd.f32 %v171_v37, %v106_v18  ;;  %v110_v49 = vadd.f32 %v109_v36, %v79_v33  ;;  %v119_v22 = vadd.f32 %v118_v42, %v83_v39  ;;  %v128_v50 = vadd.f32 %v127_v10, %v87_v45 }
  0x3c   :  { %v137_v23 = vadd.f32 %v136_v43, %v91_v48  ;;  %v146_v24 = vadd.f32 %v145_v7, %v95_v55  ;;  %v155_v25 = vadd.f32 %v154_v20, %v99_v59  ;;  %v164_v26 = vadd.f32 %v163_v44, %v103_v63 }
  0x3d   :  { %v173_v27 = vadd.f32 %v172_v21, %v107_v12  ;;  %v111_v31 = vrot.slane %v110_v49, 4  ;;  %v120_v34 = vrot.slane %v119_v22, 4  ;;  %v129_v40 = vrot.slane %v128_v50, 4 }
  0x3e   :  { %v138_v15 = vrot.slane %v137_v23, 4  ;;  %v147_v19 = vrot.slane %v146_v24, 4  ;;  %v156_v29 = vrot.slane %v155_v25, 4  ;;  %v165_v8 = vrot.slane %v164_v26, 4 }
  0x3f   :  { %v174_v30 = vrot.slane %v173_v27, 4  ;;  %v112_v3 = vadd.f32 %v111_v31, %v110_v49  ;;  %v121_v14 = vadd.f32 %v120_v34, %v119_v22  ;;  %v130_v17 = vadd.f32 %v129_v40, %v128_v50 }
  0x40   :  { %v139_v18 = vadd.f32 %v138_v15, %v137_v23  ;;  %v148_v32 = vadd.f32 %v147_v19, %v146_v24  ;;  %v157_v33 = vadd.f32 %v156_v29, %v155_v25  ;;  %v166_v10 = vadd.f32 %v165_v8, %v164_v26 }
  0x41   :  { %v175_v35 = vadd.f32 %v174_v30, %v173_v27  ;;  %v113_v7 = vrot.slane %v112_v3, 2  ;;  %v122_v36 = vrot.slane %v121_v14, 2  ;;  %v131_v37 = vrot.slane %v130_v17, 2 }
  0x42   :  { %v140_v12 = vrot.slane %v139_v18, 2  ;;  %v149_v38 = vrot.slane %v148_v32, 2  ;;  %v158_v39 = vrot.slane %v157_v33, 2  ;;  %v167_v41 = vrot.slane %v166_v10, 2 }
  0x43   :  { %v176_v42 = vrot.slane %v175_v35, 2  ;;  %v114_v43 = vadd.f32 %v113_v7, %v112_v3  ;;  %v123_v44 = vadd.f32 %v122_v36, %v121_v14  ;;  %v132_v45 = vadd.f32 %v131_v37, %v130_v17 }
  0x44   :  { %v141_v46 = vadd.f32 %v140_v12, %v139_v18  ;;  %v150_v47 = vadd.f32 %v149_v38, %v148_v32  ;;  %v159_v48 = vadd.f32 %v158_v39, %v157_v33  ;;  %v168_v49 = vadd.f32 %v167_v41, %v166_v10 }
  0x45   :  { %v177_v50 = vadd.f32 %v176_v42, %v175_v35  ;;  %v115_v52 = vrot.slane %v114_v43, 1  ;;  %v124_v53 = vrot.slane %v123_v44, 1  ;;  %v133_v54 = vrot.slane %v132_v45, 1 }
  0x46   :  { %v142_v55 = vrot.slane %v141_v46, 1  ;;  %v151_v56 = vrot.slane %v150_v47, 1  ;;  %v160_v57 = vrot.slane %v159_v48, 1  ;;  %v169_v58 = vrot.slane %v168_v49, 1 }
  0x47   :  { %v178_v59 = vrot.slane %v177_v50, 1  ;;  %v116_v60 = vadd.f32 %v115_v52, %v114_v43  ;;  %v125_v61 = vadd.f32 %v124_v53, %v123_v44  ;;  %v134_v62 = vadd.f32 %v133_v54, %v132_v45 }
  0x48   :  { %v143_v63 = vadd.f32 %v142_v55, %v141_v46  ;;  %v152_v20 = vadd.f32 %v151_v56, %v150_v47  ;;  %v161_v21 = vadd.f32 %v160_v57, %v159_v48  ;;  %v170_v22 = vadd.f32 %v169_v58, %v168_v49 }
  0x49   :  { %v179_v23 = vadd.f32 %v178_v59, %v177_v50 }
  0x4a   :  { %v180_v24 = vmax.f32 %v116_v60, %v152_v20  ;;  %v181_v25 = vmax.f32 %v125_v61, %v161_v21  ;;  %v182_v26 = vmax.f32 %v134_v62, %v170_v22 }
  0x4b   :  { %v183_v27 = vmax.f32 %v143_v63, %v179_v23 }
  0x4c   :  { %v184_v31 = vmax.f32 %v180_v24, %v181_v25 }
  0x4d   :  { %v185_v34 = vmax.f32 %v182_v26, %v183_v27 }
  0x4f   :  { %v186_v40 = vmax.f32 %v184_v31, %v185_v34 }
  0x51   :  { %v187_v15 = vsub.f32 %v116_v60, %v186_v40  ;;  %v188_v19 = vsub.f32 %v125_v61, %v186_v40  ;;  %v189_v29 = vsub.f32 %v134_v62, %v186_v40  ;;  %v190_v8 = vsub.f32 %v143_v63, %v186_v40 }
  0x52   :  { %v191_v30 = vsub.f32 %v152_v20, %v186_v40  ;;  %v192_v3 = vsub.f32 %v161_v21, %v186_v40  ;;  %v193_v14 = vsub.f32 %v170_v22, %v186_v40  ;;  %v194_v33 = vsub.f32 %v179_v23, %v186_v40 }
  0x53   :  { %v195_v17 = vmul.f32 1.442695, %v187_v15  ;;  %v197_v18 = vmul.f32 1.442695, %v188_v19  ;;  %v199_v32 = vmul.f32 1.442695, %v189_v29  ;;  %v248_v23 = vlaneseq }
  0x54   :  { %v201_v10 = vmul.f32 1.442695, %v190_v8  ;;  %v203_v35 = vmul.f32 1.442695, %v191_v30  ;;  %v205_v7 = vmul.f32 1.442695, %v192_v3 }
  0x55   :  { %379 = vpow2.f32 %v195_v17  ;;  %v207_v36 = vmul.f32 1.442695, %v193_v14  ;;  %v209_v37 = vmul.f32 1.442695, %v194_v33  ;;  %v249_v24 = vshrl.u32 %v248_v23, 7 }
  0x56   :  { %381 = vpow2.f32 %v197_v18 }
  0x57   :  { %383 = vpow2.f32 %v199_v32  ;;  %v250_v25 = vsub.s32 0, %v249_v24 }
  0x58   :  { %385 = vpow2.f32 %v201_v10 }
  0x59   :  { %387 = vpow2.f32 %v203_v35 }
  0x5a   :  { %389 = vpow2.f32 %v205_v7 }
  0x5b   :  { %391 = vpow2.f32 %v207_v36 }
  0x5c   :  { %393 = vpow2.f32 %v209_v37 }
  0x5f   :  { %v380_v12 = vpop.eup %379 }
  0x60   :  { %v382_v38 = vpop.eup %381 }
  0x61   :  { %v384_v39 = vpop.eup %383  ;;  %v219_v41 = vrot.slane %v382_v38, 7 }
  0x62   :  { %v386_v42 = vpop.eup %385  ;;  %v222_v43 = vrot.slane %v384_v39, 6 }
  0x63   :  { %v388_v44 = vpop.eup %387  ;;  %v221_v45 = vsel %vm220_vm0, %v219_v41, %v380_v12  ;;  %v225_v46 = vrot.slane %v386_v42, 5 }
  0x64   :  { %v390_v47 = vpop.eup %389  ;;  %v224_v48 = vsel %vm223_vm1, %v222_v43, %v221_v45  ;;  %v228_v49 = vrot.slane %v388_v44, 4 }
  0x65   :  { %v392_v50 = vpop.eup %391  ;;  %v227_v52 = vsel %vm226_vm2, %v225_v46, %v224_v48  ;;  %v231_v53 = vrot.slane %v390_v47, 3  ;;  %v705_v46 = vld [vmem:[#allocation12_spill] sm:$0xff] }
  0x66   :  { %v394_v54 = vpop.eup %393  ;;  %v230_v55 = vsel %vm229_vm3, %v228_v49, %v227_v52  ;;  %v234_v56 = vrot.slane %v392_v50, 2 }
  0x67   :  { %v233_v57 = vsel %vm232_vm4, %v231_v53, %v230_v55  ;;  %v237_v58 = vrot.slane %v394_v54, 1 }
  0x68   :  { %v236_v59 = vsel %vm235_vm5, %v234_v56, %v233_v57  ;;  %v711_v56 = vld [vmem:[#allocation13_spill] sm:$0xff] }
  0x69   :  { %v239_v60 = vsel %vm238_vm6, %v237_v58, %v236_v59  ;;  %v712_v58 = vld [vmem:[#allocation21_spill] sm:$0xff] }
  0x6a   :  { %v241_v61 = vrot.slane %v239_v60, 4 }
  0x6c   :  { %v242_v62 = vadd.f32 %v241_v61, %v239_v60  ;;  %v713_v60 = vld [vmem:[#allocation15_spill] sm:$0xff] }
  0x6e   :  { %v243_v63 = vrot.slane %v242_v62, 2 }
  0x70   :  { %v244_v20 = vadd.f32 %v243_v63, %v242_v62  ;;  %v714_v62 = vld [vmem:[#allocation28_spill] sm:$0xff] }
  0x72   :  { %v245_v21 = vrot.slane %v244_v20, 1 }
  0x74   :  { %v246_v22 = vadd.f32 %v245_v21, %v244_v20  ;;  %v715_v20 = vld [vmem:[#allocation25_spill] sm:$0xff] }
  0x76   :  { %395 = vrcp.f32 %v246_v22  ;;  %v716_v22 = vld [vmem:[#allocation19_spill] sm:$0xff] }
  0x80   :  { %v396_v26 = vpop.eup %395 }
  0x81   :  { %v251_v27 = vrot.slane %v396_v26, %v250_v25 }
  0x83   :  { %v252_v31 = vmul.f32 %v380_v12, %v251_v27  ;;  %v253_v34 = vmul.f32 %v382_v38, %v251_v27  ;;  %v254_v40 = vmul.f32 %v384_v39, %v251_v27  ;;  %v255_v15 = vmul.f32 %v386_v42, %v251_v27 }
  0x84   :  { %v256_v19 = vmul.f32 %v388_v44, %v251_v27  ;;  %v257_v29 = vmul.f32 %v390_v47, %v251_v27  ;;  %v258_v8 = vmul.f32 %v392_v50, %v251_v27  ;;  %v259_v35 = vmul.f32 %v394_v54, %v251_v27  ;;  %v706_v47 = vld [vmem:[#allocation14_spill] sm:$0xff]  ;;  %v717_v27 = vld [vmem:[#allocation17_spill] sm:$0xff] }
  0x85   :  { %v263_v30 = vrot.slane %v252_v31, %v250_v25  ;;  %v267_v3 = vrot.slane %v253_v34, %v250_v25  ;;  %v271_v14 = vrot.slane %v254_v40, %v250_v25  ;;  %v275_v17 = vrot.slane %v255_v15, %v250_v25  ;;  %v708_v50 = vld [vmem:[#allocation18_spill] sm:$0xff]  ;;  %v718_v40 = vld [vmem:[#allocation29_spill] sm:$0xff] }
  0x86   :  { %v279_v18 = vrot.slane %v256_v19, %v250_v25  ;;  %v283_v7 = vrot.slane %v257_v29, %v250_v25  ;;  %v287_v36 = vrot.slane %v258_v8, %v250_v25  ;;  %v291_v44 = vrot.slane %v259_v35, %v250_v25  ;;  %v719_v19 = vld [vmem:[#allocation22_spill] sm:$0xff] }
  0x87   :  { %v292_v32 = vmul.f32 %v263_v30, %v519_v0  ;;  %v296_v33 = vmul.f32 %v267_v3, %v527_v4  ;;  %v300_v10 = vmul.f32 %v271_v14, %v531_v6  ;;  %v304_v37 = vmul.f32 %v275_v17, %v541_v11 }
  0x88   :  { %v293_v38 = vmul.f32 %v263_v30, %v521_v1  ;;  %v297_v39 = vmul.f32 %v267_v3, %v529_v5  ;;  %v301_v41 = vmul.f32 %v271_v14, %v537_v9  ;;  %v308_v42 = vmul.f32 %v279_v18, %v551_v16  ;;  %v707_v1 = vld [vmem:[#allocation24_spill] sm:$0xff] }
  0x89   :  { %v324_v12 = vadd.f32 %v296_v33, %v292_v32  ;;  %v305_v0 = vmul.f32 %v275_v17, %v545_v13  ;;  %v294_v6 = vmul.f32 %v263_v30, %v523_v2  ;;  %v312_v45 = vmul.f32 %v283_v7, %v563_v28  ;;  %v709_v16 = vld [vmem:[#allocation16_spill] sm:$0xff]  ;;  %v710_v13 = vld [vmem:[#allocation11_spill] sm:$0xff] }
  0x8a   :  { %v331_v4 = vadd.f32 %v297_v39, %v293_v38  ;;  %v298_v11 = vmul.f32 %v267_v3, %v705_v46  ;;  %v302_v48 = vmul.f32 %v271_v14, %v706_v47  ;;  %v316_v49 = vmul.f32 %v287_v36, %v707_v1  ;;  %v722_v39 = vld [vmem:[#allocation23_spill] sm:$0xff] }
  0x8b   :  { %v325_v43 = vadd.f32 %v324_v12, %v300_v10  ;;  %v309_v9 = vmul.f32 %v279_v18, %v708_v50  ;;  %v306_v53 = vmul.f32 %v275_v17, %v709_v16  ;;  %v295_v55 = vmul.f32 %v263_v30, %v710_v13  ;;  %v721_v10 = vld [vmem:[#allocation26_spill] sm:$0xff] }
  0x8c   :  { %v332_v52 = vadd.f32 %v331_v4, %v301_v41  ;;  %v338_v54 = vadd.f32 %v298_v11, %v294_v6  ;;  %v299_v2 = vmul.f32 %v267_v3, %v711_v56  ;;  %v313_v28 = vmul.f32 %v283_v7, %v712_v58  ;;  %v724_v6 = vld [vmem:[#allocation27_spill] sm:$0xff] }
  0x8d   :  { %v326_v5 = vadd.f32 %v325_v43, %v304_v37  ;;  %v303_v61 = vmul.f32 %v271_v14, %v713_v60  ;;  %v320_v63 = vmul.f32 %v291_v44, %v714_v62  ;;  %v317_v21 = vmul.f32 %v287_v36, %v715_v20  ;;  %v720_v14 = vld [vmem:[#allocation20_spill] sm:$0xff] }
  0x8e   :  { %v333_v59 = vadd.f32 %v332_v52, %v305_v0  ;;  %v310_v23 = vmul.f32 %v279_v18, %v716_v22  ;;  %v339_v24 = vadd.f32 %v338_v54, %v302_v48  ;;  %v307_v31 = vmul.f32 %v275_v17, %v717_v27  ;;  %v723_v17 = vld [vmem:[#allocation30_spill] sm:$0xff] }
  0x8f   :  { %v327_v57 = vadd.f32 %v326_v5, %v308_v42  ;;  %v345_v34 = vadd.f32 %v299_v2, %v295_v55  ;;  %v321_v15 = vmul.f32 %v291_v44, %v718_v40  ;;  %v314_v29 = vmul.f32 %v283_v7, %v719_v19 }
  0x90   :  { %v334_v26 = vadd.f32 %v333_v59, %v309_v9  ;;  %v340_v8 = vadd.f32 %v339_v24, %v306_v53  ;;  %v311_v32 = vmul.f32 %v279_v18, %v720_v14  ;;  %v318_v35 = vmul.f32 %v287_v36, %v721_v10 }
  0x91   :  { %v328_v25 = vadd.f32 %v327_v57, %v312_v45  ;;  %v346_v33 = vadd.f32 %v345_v34, %v303_v61  ;;  %v315_v41 = vmul.f32 %v283_v7, %v722_v39  ;;  %v322_v43 = vmul.f32 %v291_v44, %v723_v17 }
  0x92   :  { %v335_v3 = vadd.f32 %v334_v26, %v313_v28  ;;  %v341_v37 = vadd.f32 %v340_v8, %v310_v23  ;;  %v319_v45 = vmul.f32 %v287_v36, %v724_v6  ;;  %v323_v18 = vmul.f32 %v291_v44, %v597_v51 }
  0x93   :  { %v329_v30 = vadd.f32 %v328_v25, %v316_v49  ;;  %v347_v42 = vadd.f32 %v346_v33, %v307_v31 }
  0x94   :  { %v336_v38 = vadd.f32 %v335_v3, %v317_v21  ;;  %v342_v0 = vadd.f32 %v341_v37, %v314_v29 }
  0x95   :  { %v330_v12 = vadd.f32 %v329_v30, %v320_v63  ;;  %v348_v46 = vadd.f32 %v347_v42, %v311_v32 }
  0x96   :  { %v337_v4 = vadd.f32 %v336_v38, %v321_v15  ;;  %v343_v11 = vadd.f32 %v342_v0, %v318_v35 }
  0x97   :  { %352 = vst [vmem:[#allocation7] sm:$0xff] %v330_v12  ;;  %v349_v47 = vadd.f32 %v348_v46, %v315_v41 }
  0x98   :  { %353 = vst [vmem:[#allocation7 + $0x8] sm:$0xff] %v337_v4  ;;  %v344_v48 = vadd.f32 %v343_v11, %v322_v43 }
  0x99   :  { %v350_v1 = vadd.f32 %v349_v47, %v319_v45 }
  0x9a   :  { %354 = vst [vmem:[#allocation7 + $0x10] sm:$0xff] %v344_v48 }
  0x9b   :  { %v351_v7 = vadd.f32 %v350_v1, %v323_v18 }
  0x9d   :  { %355 = vst [vmem:[#allocation7 + $0x18] sm:$0xff] %v351_v7 }
  0x9e   :  { %452 = shalt.err (!%p449_p6)
}
  0x9f   :  { %s453_s10 = scalar_lea.hbm %s664_s2, 512 }
  0xa0   :  { %p454_p7 = scmp.ne.s32.totalorder %s664_s2, %s453_s10  ;;  %p457_p8 = scmp.lt.u32.totalorder %s453_s10, %s664_s2 }
  0xa2   :  { %p459_p9 = pnand %p457_p8, %p454_p7 }
  0xa4   :  { %462 = shalt.err (!%p459_p9)
}
  0xa5   :  { %367 = dma.vmem_to_hbm [thread:$0]  %s362_s6, 512, %s664_s2, [#allocation4], %s470_s19, %s470_s19, %s471_s20  }
  0xa6   :  { %467 = dma.done.wait [#allocation4], 512  }
  0xa7   :  { %468 = vsyncadd [#allocation4], 4294966784 }
  0xa8   :  { %371 = vsyncpa [#allocation3], 1 }
  0xa9   :  { %372 = vsyncpa [#allocation6], 1 }
  0xaa   :  { %373 = vsyncpa [#allocation4], 1 }

</bundles_post_ra>
